<compile_context>
chip_gen: v7x
topology: tpu7x:2x2x1
jax: 0.10.0
libtpu: 0.0.40
codegen_flags: <defaults>
</compile_context>

<pallas_src>
import jax
import jax.numpy as jnp
from jax.experimental import pallas as pl
from jax.experimental.pallas import tpu as pltpu


def _round_up(x, m):
    return ((x + m - 1) // m) * m


def _make_fused_mlp_kernel(n_linear):
    """Kernel for the fused (both-heads) MLP on one batch tile.

    Ref order: z, [W0, b0, ..., W_{n-1}, b_{n-1}], out.
    """

    def kernel(z_ref, *refs):
        params = refs[: 2 * n_linear]
        out_ref = refs[2 * n_linear]

        # Load & cast the activation tile once; accumulate in f32 on the MXU.
        h = z_ref[...].astype(jnp.float32)
        for i in range(n_linear):
            w = params[2 * i][...].astype(jnp.float32)
            b = params[2 * i + 1][...].astype(jnp.float32)
            h = jnp.dot(h, w, preferred_element_type=jnp.float32) + b
            if i < n_linear - 1:
                h = jnp.maximum(h, 0.0)  # ReLU; Dropout is identity at inference.
        out_ref[...] = h.astype(out_ref.dtype)

    return kernel


def fuse_head_params(heads_params, param_dtype=jnp.float32):
    """Pack per-head Linear stacks [W0,b0,W1,b1,...] into one fused stack.

    Layer 0 weights are concatenated along the output dim (shared input z);
    later layers become block-diagonal so the heads stay independent.
    Returns a flat list [W0,b0,...] with widths n_heads * (per-head width).
    """
    n_linear = len(heads_params[0]) // 2
    fused = []
    for i in range(n_linear):
        ws = [hp[2 * i] for hp in heads_params]
        bs = [hp[2 * i + 1] for hp in heads_params]
        if i == 0:
            w = jnp.concatenate(ws, axis=1)
        else:
            w = jax.scipy.linalg.block_diag(*ws)
        b = jnp.concatenate(bs, axis=1)
        fused += [w.astype(param_dtype), b.astype(param_dtype)]
    return fused


def mlp_forward(z, logp_params, sas_params, *, batch_tile=512,
                param_dtype=jnp.float32):
    """Runs both MLP heads as one fused Pallas kernel.

    z: [B, latent] float32
    *_params: flat list [W0, b0, W1, b1, ...] with W_i shaped (in, out),
              b_i shaped (1, out), per head.
    Returns (logp [B], sas [B]).
    """
    fused = fuse_head_params([logp_params, sas_params], param_dtype=param_dtype)
    n_linear = len(fused) // 2
    out_width = fused[-1].shape[1]  # n_heads * output_size (= 2 here)

    B, latent = z.shape
    # Collapse the grid: one step for small batches; >=8-row (sublane) tiles,
    # large tiles (default 512 rows) for production-sized batches.
    tile = min(batch_tile, _round_up(B, 8))
    B_pad = _round_up(B, tile)
    if B_pad != B:
        z = jnp.pad(z, ((0, B_pad - B), (0, 0)))

    kernel = _make_fused_mlp_kernel(n_linear)

    z_spec = pl.BlockSpec((tile, latent), lambda i: (i, 0))

    def full_spec(arr):
        # Weights/biases stay fully resident; constant index map.
        return pl.BlockSpec(arr.shape, lambda i, _nd=arr.ndim: (0,) * _nd)

    param_specs = [full_spec(p) for p in fused]
    # Single merged (tile, 2) output: lane-denser than two width-1 outputs.
    out_spec = pl.BlockSpec((tile, out_width), lambda i: (i, 0))

    out = pl.pallas_call(
        kernel,
        out_shape=jax.ShapeDtypeStruct((B_pad, out_width), jnp.float32),
        grid_spec=pltpu.PrefetchScalarGridSpec(
            num_scalar_prefetch=0,
            grid=(B_pad // tile,),
            in_specs=[z_spec] + param_specs,
            out_specs=out_spec,
        ),
        compiler_params=pltpu.CompilerParams(
            # Per-step work is tiny; no benefit from sharding the grid across
            # TensorCores (and grid is 1 for small B anyway).
            dimension_semantics=("arbitrary",)),
    )(z, *fused)

    out = out[:B]
    # squeeze(-1) per head, as in the PyTorch forward.
    return out[:, 0], out[:, 1]


def init_head_params(key, latent_size, hidden_size, hidden_layers, output_size):
    """Deterministic init of one head's Linear stack (weights pre-transposed)."""
    sizes = [latent_size] + [hidden_size] * hidden_layers + [output_size]
    params = []
    for i in range(len(sizes) - 1):
        key, kw, kb = jax.random.split(key, 3)
        fan_in, fan_out = sizes[i], sizes[i + 1]
        bound = 1.0 / jnp.sqrt(fan_in)
        w = jax.random.uniform(kw, (fan_in, fan_out), jnp.float32, -bound, bound)
        b = jax.random.uniform(kb, (1, fan_out), jnp.float32, -bound, bound)
        params += [w, b]
    return params, key


def mlp_reference(z, params):
    n_linear = len(params) // 2
    h = z
    for i in range(n_linear):
        h = h @ params[2 * i] + params[2 * i + 1]
        if i < n_linear - 1:
            h = jnp.maximum(h, 0.0)
    return h[:, 0]


if __name__ == "__main__":
    # Config-equivalent: pred_logp=True, pred_sas=True,
    # latent_size=32, hidden_size_mlp=32, hidden_layers_mlp=2,
    # dropout=0.1 (inactive at inference), output_size=1.
    latent_size = 32
    hidden_size_mlp = 32
    hidden_layers_mlp = 2
    output_size = 1
    B = 16

    key = jax.random.PRNGKey(0)
    key, kz = jax.random.split(key)
    z = jax.random.normal(kz, (B, latent_size), jnp.float32)

    logp_params, key = init_head_params(
        key, latent_size, hidden_size_mlp, hidden_layers_mlp, output_size)
    sas_params, key = init_head_params(
        key, latent_size, hidden_size_mlp, hidden_layers_mlp, output_size)

    logp, sas = mlp_forward(z, logp_params, sas_params)
    jax.block_until_ready((logp, sas))

    # Cross-check against a pure-JAX reference of the same math (per head).
    logp_ref = mlp_reference(z, logp_params)
    sas_ref = mlp_reference(z, sas_params)
    assert logp.shape == (B,) and sas.shape == (B,)
    assert jnp.allclose(logp, logp_ref, atol=1e-5, rtol=1e-5)
    assert jnp.allclose(sas, sas_ref, atol=1e-5, rtol=1e-5)

    print("KERNEL_OK")
</pallas_src>

<mosaic_0001>
module attributes {stable_mosaic.version = 11 : i64} {
  func.func @kernel(%arg0: i32, %arg1: memref<16x32xf32, #tpu.memory_space<vmem>>, %arg2: memref<32x64xf32, #tpu.memory_space<vmem>>, %arg3: memref<1x64xf32, #tpu.memory_space<vmem>>, %arg4: memref<64x64xf32, #tpu.memory_space<vmem>>, %arg5: memref<1x64xf32, #tpu.memory_space<vmem>>, %arg6: memref<64x2xf32, #tpu.memory_space<vmem>>, %arg7: memref<1x2xf32, #tpu.memory_space<vmem>>, %arg8: memref<16x2xf32, #tpu.memory_space<vmem>>) attributes {dimension_semantics = [#tpu.dimension_semantics<arbitrary>], iteration_bounds = array<i64: 1>, scalar_prefetch = 0 : i64, scratch_operands = 0 : i64, tpu.core_type = #tpu.core_type<tc>, window_params = [{transform_indices = @transform_0, window_bounds = array<i64: 16, 32>}, {pipeline_mode = #tpu.pipeline_mode<synchronous>, transform_indices = @transform_1, window_bounds = array<i64: 32, 64>}, {pipeline_mode = #tpu.pipeline_mode<synchronous>, transform_indices = @transform_2, window_bounds = array<i64: 1, 64>}, {pipeline_mode = #tpu.pipeline_mode<synchronous>, transform_indices = @transform_3, window_bounds = array<i64: 64, 64>}, {pipeline_mode = #tpu.pipeline_mode<synchronous>, transform_indices = @transform_4, window_bounds = array<i64: 1, 64>}, {pipeline_mode = #tpu.pipeline_mode<synchronous>, transform_indices = @transform_5, window_bounds = array<i64: 64, 2>}, {pipeline_mode = #tpu.pipeline_mode<synchronous>, transform_indices = @transform_6, window_bounds = array<i64: 1, 2>}, {transform_indices = @transform_7, window_bounds = array<i64: 16, 2>}]} {
    %c0 = arith.constant 0 : index
    %c0_0 = arith.constant 0 : index
    %0 = vector.load %arg1[%c0, %c0_0] : memref<16x32xf32, #tpu.memory_space<vmem>>, vector<16x32xf32>
    %c0_1 = arith.constant 0 : index
    %c0_2 = arith.constant 0 : index
    %1 = vector.load %arg2[%c0_1, %c0_2] : memref<32x64xf32, #tpu.memory_space<vmem>>, vector<32x64xf32>
    %c0_3 = arith.constant 0 : index
    %c0_4 = arith.constant 0 : index
    %2 = vector.load %arg3[%c0_3, %c0_4] : memref<1x64xf32, #tpu.memory_space<vmem>>, vector<1x64xf32>
    %cst = arith.constant dense<0.000000e+00> : vector<16x64xf32>
    %3 = tpu.matmul %0, %1, %cst {dimension_numbers = #tpu.dot_dimension_numbers<[1], [0], [0], [1], [0, 0, 1, 1], [], []>} : vector<16x32xf32>, vector<32x64xf32>, vector<16x64xf32> -> vector<16x64xf32>
    %4 = vector.broadcast %2 : vector<1x64xf32> to vector<16x64xf32>
    %5 = arith.addf %3, %4 : vector<16x64xf32>
    %cst_5 = arith.constant 0.000000e+00 : f32
    %6 = vector.broadcast %cst_5 : f32 to vector<16x64xf32>
    %7 = arith.maximumf %5, %6 : vector<16x64xf32>
    %c0_6 = arith.constant 0 : index
    %c0_7 = arith.constant 0 : index
    %8 = vector.load %arg4[%c0_6, %c0_7] : memref<64x64xf32, #tpu.memory_space<vmem>>, vector<64x64xf32>
    %c0_8 = arith.constant 0 : index
    %c0_9 = arith.constant 0 : index
    %9 = vector.load %arg5[%c0_8, %c0_9] : memref<1x64xf32, #tpu.memory_space<vmem>>, vector<1x64xf32>
    %cst_10 = arith.constant dense<0.000000e+00> : vector<16x64xf32>
    %10 = tpu.matmul %7, %8, %cst_10 {dimension_numbers = #tpu.dot_dimension_numbers<[1], [0], [0], [1], [0, 0, 1, 1], [], []>} : vector<16x64xf32>, vector<64x64xf32>, vector<16x64xf32> -> vector<16x64xf32>
    %11 = vector.broadcast %9 : vector<1x64xf32> to vector<16x64xf32>
    %12 = arith.addf %10, %11 : vector<16x64xf32>
    %cst_11 = arith.constant 0.000000e+00 : f32
    %13 = vector.broadcast %cst_11 : f32 to vector<16x64xf32>
    %14 = arith.maximumf %12, %13 : vector<16x64xf32>
    %c0_12 = arith.constant 0 : index
    %c0_13 = arith.constant 0 : index
    %15 = vector.load %arg6[%c0_12, %c0_13] : memref<64x2xf32, #tpu.memory_space<vmem>>, vector<64x2xf32>
    %c0_14 = arith.constant 0 : index
    %c0_15 = arith.constant 0 : index
    %16 = vector.load %arg7[%c0_14, %c0_15] : memref<1x2xf32, #tpu.memory_space<vmem>>, vector<1x2xf32>
    %cst_16 = arith.constant dense<0.000000e+00> : vector<16x2xf32>
    %17 = tpu.matmul %14, %15, %cst_16 {dimension_numbers = #tpu.dot_dimension_numbers<[1], [0], [0], [1], [0, 0, 1, 1], [], []>} : vector<16x64xf32>, vector<64x2xf32>, vector<16x2xf32> -> vector<16x2xf32>
    %18 = vector.broadcast %16 : vector<1x2xf32> to vector<16x2xf32>
    %19 = arith.addf %17, %18 : vector<16x2xf32>
    %c0_17 = arith.constant 0 : index
    %c0_18 = arith.constant 0 : index
    %20 = vector.load %arg8[%c0_17, %c0_18] : memref<16x2xf32, #tpu.memory_space<vmem>>, vector<16x2xf32>
    tpu.vector_store %arg8[%c0_17, %c0_18], %19 {strides = array<i32>} : memref<16x2xf32, #tpu.memory_space<vmem>>, vector<16x2xf32>,
    return
  }
  func.func @transform_0(%arg0: i32) -> (i32, i32) {
    %c0_i32 = arith.constant 0 : i32
    %c0_i32_0 = arith.constant 0 : i32
    return %arg0, %c0_i32 : i32, i32
  }
  func.func @transform_1(%arg0: i32) -> (i32, i32) {
    %c0_i32 = arith.constant 0 : i32
    %c0_i32_0 = arith.constant 0 : i32
    %c0_i32_1 = arith.constant 0 : i32
    return %c0_i32, %c0_i32_0 : i32, i32
  }
  func.func @transform_2(%arg0: i32) -> (i32, i32) {
    %c0_i32 = arith.constant 0 : i32
    %c0_i32_0 = arith.constant 0 : i32
    %c0_i32_1 = arith.constant 0 : i32
    return %c0_i32, %c0_i32_0 : i32, i32
  }
  func.func @transform_3(%arg0: i32) -> (i32, i32) {
    %c0_i32 = arith.constant 0 : i32
    %c0_i32_0 = arith.constant 0 : i32
    %c0_i32_1 = arith.constant 0 : i32
    return %c0_i32, %c0_i32_0 : i32, i32
  }
  func.func @transform_4(%arg0: i32) -> (i32, i32) {
    %c0_i32 = arith.constant 0 : i32
    %c0_i32_0 = arith.constant 0 : i32
    %c0_i32_1 = arith.constant 0 : i32
    return %c0_i32, %c0_i32_0 : i32, i32
  }
  func.func @transform_5(%arg0: i32) -> (i32, i32) {
    %c0_i32 = arith.constant 0 : i32
    %c0_i32_0 = arith.constant 0 : i32
    %c0_i32_1 = arith.constant 0 : i32
    return %c0_i32, %c0_i32_0 : i32, i32
  }
  func.func @transform_6(%arg0: i32) -> (i32, i32) {
    %c0_i32 = arith.constant 0 : i32
    %c0_i32_0 = arith.constant 0 : i32
    %c0_i32_1 = arith.constant 0 : i32
    return %c0_i32, %c0_i32_0 : i32, i32
  }
  func.func @transform_7(%arg0: i32) -> (i32, i32) {
    %c0_i32 = arith.constant 0 : i32
    %c0_i32_0 = arith.constant 0 : i32
    return %arg0, %c0_i32 : i32, i32
  }
}

</mosaic_0001>

<bundles_post_ra>
// kernel: tpu_custom_call.1
= control target key start
LH: loop header
LB: loop body
LE: loop exit
PB: predicated region body
PF: predicated region fallthrough
CT: control target
= control target key end

     0   :  { %12 = vsyncpa [#allocation3], 0  ;;  %s668_s0 = inlined_call_operand.hbm [shape: f32[16,32], index: 0, kind: input, shape index: {}]   ;;  %s669_s1 = inlined_call_operand.hbm [shape: f32[32,64], index: 1, kind: input, shape index: {}]   ;;  %s670_s2 = inlined_call_operand.vmem [shape: f32[1,64], index: 2, kind: input, shape index: {}]   ;;  %s671_s3 = inlined_call_operand.vmem [shape: f32[64,64], index: 3, kind: input, shape index: {}]   ;;  %s672_s4 = inlined_call_operand.vmem [shape: f32[1,64], index: 4, kind: input, shape index: {}]   ;;  %s673_s5 = inlined_call_operand.vmem [shape: f32[64,2], index: 5, kind: input, shape index: {}]   ;;  %s674_s6 = inlined_call_operand.vmem [shape: f32[1,2], index: 6, kind: input, shape index: {}]   ;;  %s675_s7 = inlined_call_operand.vmem [shape: f32[16,2], index: 7, kind: output, shape index: {}]  }
   0x1   :  { %13 = vsyncpa [#allocation5], 0  ;;  %s531_s24 = smov [#allocation2]   ;;  %s483_s28 = scalar_lea.hbm %s668_s0, 256 }
   0x2   :  { %s19_s25 = sshll.u32 %s531_s24, 4  ;;  %p484_p0 = scmp.ne.s32.totalorder %s668_s0, %s483_s28  ;;  %s20_s25 = int_to_ptr.vmem [resolvable:$true] %s19_s25 }
   0x3   :  { %p487_p1 = scmp.lt.u32.totalorder %s483_s28, %s668_s0 }
   0x5   :  { %p489_p2 = pnand %p487_p1, %p484_p0 }
   0x7   :  { %492 = shalt.err (!%p489_p2)
}
   0x8   :  { %s493_s10 = scalar_lea.vmem %s20_s25, 256  ;;  %p498_p4 = scmp.lt.s32.totalorder %s20_s25, %s20_s25 }
   0x9   :  { %p494_p3 = scmp.ne.s32.totalorder %s20_s25, %s493_s10  ;;  %p499_p5 = scmp.lt.s32.totalorder %s493_s10, %s493_s10 }
   0xb   :  { %p500_p6 = por %p499_p5, %p498_p4 }
   0xd   :  { %p501_p7 = pnand %p500_p6, %p494_p3 }
   0xf   :  { %504 = shalt.err (!%p501_p7)
}
  0x10   :  { %s532_s11 = smov 128   ;;  %s533_s12 = smov 8  }
  0x11   :  { %25 = dma.hbm_to_vmem [thread:$0]  %s668_s0, 256, %s20_s25, [#allocation3], %s532_s11, %s532_s11, %s533_s12  }
  0x12   :  { %s534_s15 = smov [#allocation4]   ;;  %s505_s19 = scalar_lea.hbm %s669_s1, 512 }
  0x13   :  { %s31_s16 = sshll.u32 %s534_s15, 4  ;;  %p506_p8 = scmp.ne.s32.totalorder %s669_s1, %s505_s19  ;;  %s32_s16 = int_to_ptr.vmem [resolvable:$true] %s31_s16 }
  0x14   :  { %p509_p9 = scmp.lt.u32.totalorder %s505_s19, %s669_s1 }
  0x16   :  { %p511_p10 = pnand %p509_p9, %p506_p8 }
  0x18   :  { %514 = shalt.err (!%p511_p10)
}
  0x19   :  { %s515_s24 = scalar_lea.vmem %s32_s16, 512  ;;  %p520_p12 = scmp.lt.s32.totalorder %s32_s16, %s32_s16 }
  0x1a   :  { %p516_p11 = scmp.ne.s32.totalorder %s32_s16, %s515_s24  ;;  %p521_p13 = scmp.lt.s32.totalorder %s515_s24, %s515_s24 }
  0x1c   :  { %p522_p0 = por %p521_p13, %p520_p12 }
  0x1e   :  { %p523_p1 = pnand %p522_p0, %p516_p11 }
  0x20   :  { %526 = shalt.err (!%p523_p1)
}
  0x21   :  { %37 = dma.hbm_to_vmem [thread:$0]  %s669_s1, 512, %s32_s16, [#allocation5], %s532_s11, %s532_s11, %s533_s12  }
  0x22   :  { %527 = dma.done.wait [#allocation3], 256  }
  0x23   :  { %528 = vsyncadd [#allocation3], 4294967040 }
  0x24   :  { %529 = dma.done.wait [#allocation5], 512  }
  0x25   :  { %530 = vsyncadd [#allocation5], 4294966784  ;;  %vm67_vm0 = vcmask 261120   ;;  %v56_v0 = vld [vmem:[#allocation4] sm:$0xff]  ;;  %v57_v1 = vld [vmem:[#allocation4 + $0x8] sm:$0xff]  ;;  %vm166_vm1 = vcmask 523264  }
  0x26   :  { %v58_v2 = vld [vmem:[#allocation4 + $0x10] sm:$0xff]  ;;  %v439_v3 = vpack.c.bf16 %v57_v1, %v56_v0  ;;  %v59_v4 = vld [vmem:[#allocation4 + $0x18] sm:$0xff]  ;;  %v153_v9 = vld [vmem:[%s671_s3 + $0x10] sm:$0xff]  ;;  %vm346_vm2 = vcmask 15360  }
  0x27   :  { %v54_v5 = vld [vmem:[#allocation2] sm:$0xff]  ;;  %v443_v6 = vpack.c.bf16 %v59_v4, %v58_v2  ;;  %v152_v8 = vld [vmem:[%s671_s3 + $0x8] sm:$0xff]  ;;  %v154_v11 = vld [vmem:[%s671_s3 + $0x18] sm:$0xff] }
  0x28   :  { %398 = vmatprep.mubr.msk.f32.mxu0 %vm67_vm0, %v54_v5  ;;  %v151_v7 = vld [vmem:[%s671_s3] sm:$0xff]  ;;  %440 = vmatprep.subr.bf16.mxu0 %v439_v3  ;;  %v451_v12 = vpack.c.bf16 %v154_v11, %v153_v9  ;;  %v156_v14 = vld [vmem:[%s671_s3 + $0x28] sm:$0xff]  ;;  %v157_v17 = vld [vmem:[%s671_s3 + $0x30] sm:$0xff] }
  0x29   :  { %v447_v10 = vpack.c.bf16 %v152_v8, %v151_v7  ;;  %442 = vmatpush3.bf16.msra.mxu0 %v439_v3  ;;  %v155_v13 = vld [vmem:[%s671_s3 + $0x20] sm:$0xff]  ;;  %v55_v16 = vld [vmem:[#allocation2 + $0x8] sm:$0xff]  ;;  %v158_v18 = vld [vmem:[%s671_s3 + $0x38] sm:$0xff] }
  0x2a   :  { %444 = vmatprep.subr.bf16.mxu0 %v443_v6  ;;  %v455_v15 = vpack.c.bf16 %v156_v14, %v155_v13  ;;  %v459_v19 = vpack.c.bf16 %v158_v18, %v157_v17  ;;  %v250_v20 = vld [vmem:[%s673_s5] sm:$0xff]  ;;  %v251_v21 = vld [vmem:[%s673_s5 + $0x8] sm:$0xff]  ;;  %v252_v22 = vld [vmem:[%s673_s5 + $0x10] sm:$0xff] }
  0x2b   :  { %448 = vmatprep.subr.bf16.mxu1 %v447_v10  ;;  %v463_v23 = vpack.c.bf16 %v251_v21, %v250_v20  ;;  %v253_v24 = vld [vmem:[%s673_s5 + $0x18] sm:$0xff]  ;;  %v254_v26 = vld [vmem:[%s673_s5 + $0x20] sm:$0xff]  ;;  %v255_v27 = vld [vmem:[%s673_s5 + $0x28] sm:$0xff] }
  0x2c   :  { %450 = vmatpush3.bf16.msra.mxu1 %v447_v10  ;;  %v467_v25 = vpack.c.bf16 %v253_v24, %v252_v22  ;;  %v471_v28 = vpack.c.bf16 %v255_v27, %v254_v26  ;;  %v355_v29 = vld [vmem:[%s670_s2] ss:$0 sm:$0xff]  ;;  %v256_v36 = vld [vmem:[%s673_s5 + $0x30] sm:$0xff]  ;;  %v257_v37 = vld [vmem:[%s673_s5 + $0x38] sm:$0xff] }
  0x2d   :  { %452 = vmatprep.subr.bf16.mxu1 %v451_v12  ;;  %446 = vmatpush3.bf16.msra.mxu0 %v443_v6  ;;  %v475_v38 = vpack.c.bf16 %v257_v37, %v256_v36  ;;  %v358_v39 = vld [vmem:[%s672_s4] ss:$0 sm:$0xff] }
  0x2e   :  { %464 = vmatprep.subr.bf16.mxu0 %v463_v23  ;;  %v361_v46 = vld [vmem:[%s674_s6] ss:$0 sm:$0xff] }
  0x30   :  { %454 = vmatpush3.bf16.msra.mxu1 %v451_v12  ;;  %399 = vmatmul.mubr.msk.f32.vlgmr.msra.gmra.mrb[0].mxu0 %vm67_vm0, %v55_v16 }
  0x31   :  { %456 = vmatprep.subr.bf16.mxu1 %v455_v15  ;;  %466 = vmatpush3.bf16.msra.mxu0 %v463_v23 }
  0x32   :  { %468 = vmatprep.subr.bf16.mxu0 %v467_v25 }
  0x34   :  { %458 = vmatpush3.bf16.msra.mxu1 %v455_v15 }
  0x35   :  { %460 = vmatprep.subr.bf16.mxu1 %v459_v19  ;;  %470 = vmatpush3.bf16.msra.mxu0 %v467_v25 }
  0x36   :  { %472 = vmatprep.subr.bf16.mxu0 %v471_v28 }
  0x38   :  { %462 = vmatpush3.bf16.msra.mxu1 %v459_v19 }
  0x39   :  { %474 = vmatpush3.bf16.msra.mxu0 %v471_v28 }
  0x3a   :  { %476 = vmatprep.subr.bf16.mxu0 %v475_v38 }
  0x3d   :  { %478 = vmatpush3.bf16.msra.mxu0 %v475_v38 }
 0x103   :  { %v400_v30 = vpop.f32.mrb[0].mxu0 }
 0x104   :  { %v146_v31 = vadd.f32 %v400_v30, %v355_v29  ;;  %v140_v32 = vpop.f32.mrb[1].mxu0 }
 0x105   :  { %v141_v33 = vadd.f32 %v355_v29, %v140_v32 }
 0x106   :  { %v150_v35 = vmax.f32 %v146_v31, 0.0 }
 0x107   :  { %v149_v34 = vmax.f32 %v141_v33, 0.0 }
 0x109   :  { %417 = vmatprep.mubr.msk.f32.mxu1 %vm166_vm1, %v149_v34 }
 0x10a   :  { %418 = vmatmul.mubr.msk.f32.vlgmr.msra.gmra.mrb[0].mxu1 %vm166_vm1, %v150_v35 }
 0x1dd   :  { %v419_v40 = vpop.f32.mrb[0].mxu1 }
 0x1de   :  { %v245_v41 = vadd.f32 %v419_v40, %v358_v39  ;;  %v239_v42 = vpop.f32.mrb[1].mxu1 }
 0x1df   :  { %v240_v43 = vadd.f32 %v358_v39, %v239_v42 }
 0x1e0   :  { %v249_v45 = vmax.f32 %v245_v41, 0.0 }
 0x1e1   :  { %v248_v44 = vmax.f32 %v240_v43, 0.0 }
 0x1e3   :  { %436 = vmatprep.mubr.msk.f32.mxu0 %vm166_vm1, %v248_v44 }
 0x1e4   :  { %437 = vmatmul.mubr.msk.f32.vlgmr.msra.gmra.mrb[2].mxu0 %vm166_vm1, %v249_v45 }
 0x2b7   :  { %v438_v47 = vpop.f32.mrb[2].mxu0 }
 0x2b8   :  { %v343_v48 = vadd.f32 %v438_v47, %v361_v46  ;;  %v337_v49 = vpop.f32.mrb[3].mxu0 }
 0x2b9   :  { %v338_v50 = vadd.f32 %v361_v46, %v337_v49 }
 0x2ba   :  { %348 = vst.msk [vmem:[%s675_s7 + $0x8] sm:$0xff] %vm346_vm2, %v343_v48 }
 0x2bb   :  { %347 = vst.msk [vmem:[%s675_s7] sm:$0xff] %vm346_vm2, %v338_v50 }
 0x2bc   :  { %353 = vsyncpa [#allocation3], 1 }
 0x2bd   :  { %354 = vsyncpa [#allocation5], 1 }

</bundles_post_ra>
